<compile_context>
chip_gen: v7x
topology: tpu7x:2x2x1
jax: 0.10.0
libtpu: 0.0.40
codegen_flags: <defaults>
</compile_context>

<pallas_src>
import functools

import jax
import jax.numpy as jnp
from jax.experimental import pallas as pl
from jax.experimental.pallas import tpu as pltpu


def _round_up(x, m):
    return ((x + m - 1) // m) * m


def _se_kernel(x_ref, w_ref, b_ref, o_ref, acc_ref, pool_ref, *,
               hw, hw_tile, c, inv_hw):
    # x_ref   : (1, C, hw_tile)   native-dtype input tile (C on sublanes)
    # w_ref   : (C_pad, C_pad)    Linear weight, pre-transposed (in, out)
    # b_ref   : (1, C_pad)        Linear bias (f32)
    # o_ref   : (1, 1, C_pad)     lane-dense output slab
    # acc_ref : (1, C, hw_tile)   f32 running spatial sum (resident over k)
    # pool_ref: (1, C_pad)        f32 staging row for the MXU dot
    k = pl.program_id(1)
    nk = pl.num_programs(1)

    @pl.when(k == 0)
    def _():
        acc_ref[...] = jnp.zeros_like(acc_ref)

    x = x_ref[...].astype(jnp.float32)
    if hw % hw_tile != 0:
        # Only the last spatial block can be partial; mask its OOB lanes.
        lane = jax.lax.broadcasted_iota(jnp.int32, x.shape, 2)
        x = jnp.where(k * hw_tile + lane < hw, x, 0.0)
    acc_ref[...] += x                                   # aligned VPU adds only

    @pl.when(k == nk - 1)
    def _():
        pooled = jnp.sum(acc_ref[...], axis=-1) * inv_hw          # (1, C) f32
        # Stage into a zeroed lane-padded row so the dot shapes stay aligned.
        pool_ref[...] = jnp.zeros_like(pool_ref)
        pool_ref[:, 0:c] = pooled
        z = jnp.dot(pool_ref[...].astype(w_ref.dtype), w_ref[...],
                    preferred_element_type=jnp.float32)           # MXU
        z = z + b_ref[...]
        z = jnp.maximum(z, 0.0)                                   # ReLU (VPU)
        y = jax.nn.sigmoid(z)                                     # EUP
        o_ref[...] = y.reshape(o_ref.shape).astype(o_ref.dtype)


def se_block_forward(x, weight, bias, *, dot_dtype=jnp.bfloat16,
                     max_hw_tile=2048):
    """SEBlock forward.

    x: (N, C, H, W); weight: (C, C) PyTorch Linear weight (out, in);
    bias: (C,).  Returns sigmoid(relu(mean_{H,W}(x) @ W.T + b)) as
    (N, C, 1, 1) in x.dtype.
    """
    N, C, H, W = x.shape
    HW = H * W
    C_pad = _round_up(max(C, 128), 128)
    x_itemsize = jnp.dtype(x.dtype).itemsize
    out_dtype = x.dtype

    # Free relayout: NCHW is contiguous, so this is a metadata-only reshape.
    x3 = x.reshape(N, C, HW)

    # PyTorch Linear: y = pooled @ W.T + b.  Pass W.T (in, out), zero-padded to
    # (C_pad, C_pad); padded rows/cols contribute exactly zero.  The weight is
    # held in VMEM as bf16 (MXU-native); the bias stays f32.
    w_t = jnp.pad(weight.T, ((0, C_pad - C), (0, C_pad - C))).astype(dot_dtype)
    b_p = jnp.pad(bias.astype(jnp.float32), (0, C_pad - C)).reshape(1, C_pad)

    # ---- VMEM-budget-driven spatial tile -----------------------------------
    try:
        vmem_cap = int(pltpu.get_tpu_info().vmem_capacity_bytes)
    except Exception:  # conservative default = v7x per-core VMEM
        vmem_cap = 64 * 1024 * 1024
    budget = vmem_cap // 2
    w_bytes = C_pad * C_pad * jnp.dtype(dot_dtype).itemsize
    # weight (allow 2 buffers for the fallback path) + bias/pool/out + slack
    fixed = 2 * w_bytes + 16 * C_pad * 4 + (1 << 20)

    hw_tile = max(128, _round_up(min(int(max_hw_tile), 2048), 128))
    while hw_tile > 128:
        if C * hw_tile * (2 * x_itemsize + 4) + fixed <= budget:
            break
        hw_tile //= 2
    if HW <= hw_tile:
        hw_tile = HW                      # single spatial step, never masked
    nk = pl.cdiv(HW, hw_tile)

    need = C * hw_tile * (2 * x_itemsize + 4) + fixed
    vmem_limit = int(min(max(need, 32 * 1024 * 1024), vmem_cap))

    cost = pl.CostEstimate(
        flops=int(N * HW * C + 2 * N * C_pad * C_pad),
        transcendentals=int(N * C_pad),
        bytes_accessed=int(N * C * HW * x_itemsize + w_bytes
                           + N * C_pad * jnp.dtype(out_dtype).itemsize),
    )

    kernel = functools.partial(_se_kernel, hw=HW, hw_tile=hw_tile, c=C,
                               inv_hw=1.0 / float(HW))
    out_shape = jax.ShapeDtypeStruct((N, 1, C_pad), out_dtype)
    scratch_shapes = [
        pltpu.VMEM((1, C, hw_tile), jnp.float32),   # spatial sum accumulator
        pltpu.VMEM((1, C_pad), jnp.float32),        # zero-padded pooled row
    ]

    def _const_spec(block_shape, single_buffer):
        nd = len(block_shape)
        index_map = lambda n, k: (0,) * nd
        if single_buffer:
            # Constant (weight / bias) blocks: one VMEM buffer is enough.
            return pl.BlockSpec(block_shape, index_map,
                                pipeline_mode=pl.Buffered(1))
        return pl.BlockSpec(block_shape, index_map)

    def _call(single_buffer):
        return pl.pallas_call(
            kernel,
            out_shape=out_shape,
            grid_spec=pltpu.PrefetchScalarGridSpec(
                num_scalar_prefetch=0,
                grid=(N, nk),
                in_specs=[
                    # Native-dtype activation stream (double-buffered).
                    pl.BlockSpec((1, C, hw_tile), lambda n, k: (n, 0, k)),
                    _const_spec((C_pad, C_pad), single_buffer),
                    _const_spec((1, C_pad), single_buffer),
                ],
                out_specs=pl.BlockSpec((1, 1, C_pad), lambda n, k: (n, 0, 0)),
                scratch_shapes=scratch_shapes,
            ),
            compiler_params=pltpu.CompilerParams(
                dimension_semantics=("parallel", "arbitrary"),
                vmem_limit_bytes=vmem_limit),
            cost_estimate=cost,
        )(x3, w_t, b_p)

    try:
        out = _call(single_buffer=True)
    except Exception:
        # Fallback for Pallas versions without pipeline_mode=pl.Buffered(1).
        out = _call(single_buffer=False)

    return out.reshape(N, C_pad)[:, :C].reshape(N, C, 1, 1)


def _reference(x, weight, bias, dot_dtype=jnp.bfloat16):
    pooled = jnp.mean(x.astype(jnp.float32), axis=(2, 3))             # (N, C)
    z = jnp.dot(pooled.astype(dot_dtype), weight.T.astype(dot_dtype),
                preferred_element_type=jnp.float32)
    z = z + bias.astype(jnp.float32)
    z = jnp.maximum(z, 0.0)
    y = jax.nn.sigmoid(z)
    return y.reshape(x.shape[0], x.shape[1], 1, 1).astype(x.dtype)


if __name__ == "__main__":
    key = jax.random.PRNGKey(0)
    kx, kw, kb, kx2 = jax.random.split(key, 4)

    # Case 1: shapes implied by the module (N=2, C=4, H=W=16), f32 activations.
    N, C, H, W = 2, 4, 16, 16
    x = jax.random.normal(kx, (N, C, H, W), dtype=jnp.float32)
    weight = jax.random.normal(kw, (C, C), dtype=jnp.float32) * 0.1
    bias = jax.random.normal(kb, (C,), dtype=jnp.float32) * 0.1

    y = jax.block_until_ready(se_block_forward(x, weight, bias))
    y_ref = _reference(x, weight, bias)
    assert jnp.allclose(y, y_ref, rtol=1e-3, atol=1e-3), (y, y_ref)

    # Case 2: unaligned spatial extent + forced multi-step reduction (covers
    # the masked last tile) with native bf16 activation streaming.
    N2, C2, H2, W2 = 3, 6, 23, 17
    x2 = jax.random.normal(kx2, (N2, C2, H2, W2), dtype=jnp.bfloat16)
    w2 = jax.random.normal(kw, (C2, C2), dtype=jnp.float32) * 0.1
    b2 = jax.random.normal(kb, (C2,), dtype=jnp.float32) * 0.1
    y2 = jax.block_until_ready(se_block_forward(x2, w2, b2, max_hw_tile=128))
    y2_ref = _reference(x2, w2, b2)
    assert jnp.allclose(y2.astype(jnp.float32), y2_ref.astype(jnp.float32),
                        rtol=2e-2, atol=2e-2), (y2, y2_ref)

    print("KERNEL_OK")
</pallas_src>

<mosaic_0001>
module attributes {stable_mosaic.version = 11 : i64} {
  func.func @_se_kernel(%arg0: i32, %arg1: i32, %arg2: memref<1x4x256xf32, #tpu.memory_space<vmem>>, %arg3: memref<128x128xbf16, #tpu.memory_space<vmem>>, %arg4: memref<1x128xf32, #tpu.memory_space<vmem>>, %arg5: memref<1x1x128xf32, #tpu.memory_space<vmem>>, %arg6: memref<1x4x256xf32, #tpu.memory_space<vmem>>, %arg7: memref<1x128xf32, #tpu.memory_space<vmem>>) attributes {dimension_semantics = [#tpu.dimension_semantics<parallel>, #tpu.dimension_semantics<arbitrary>], iteration_bounds = array<i64: 2, 1>, scalar_prefetch = 0 : i64, scratch_operands = 2 : i64, tpu.core_type = #tpu.core_type<tc>, window_params = [{transform_indices = @transform_0, window_bounds = array<i64: 1, 4, 256>}, {pipeline_mode = #tpu.pipeline_mode<synchronous>, transform_indices = @transform_1, window_bounds = array<i64: 128, 128>}, {pipeline_mode = #tpu.pipeline_mode<synchronous>, transform_indices = @transform_2, window_bounds = array<i64: 1, 128>}, {transform_indices = @transform_3, window_bounds = array<i64: 1, 1, 128>}]} {
    %c0_i32 = arith.constant 0 : i32
    %0 = arith.cmpi eq, %arg1, %c0_i32 : i32
    %1 = arith.extui %0 : i1 to i32
    %c0_i32_0 = arith.constant 0 : i32
    %2 = arith.cmpi ne, %1, %c0_i32_0 : i32
    scf.if %2 {
      %cst = arith.constant 0.000000e+00 : f32
      %10 = vector.broadcast %cst : f32 to vector<1x4x256xf32>
      %c0_11 = arith.constant 0 : index
      %c0_12 = arith.constant 0 : index
      %c0_13 = arith.constant 0 : index
      %11 = vector.load %arg6[%c0_11, %c0_12, %c0_13] : memref<1x4x256xf32, #tpu.memory_space<vmem>>, vector<1x4x256xf32>
      tpu.vector_store %arg6[%c0_11, %c0_12, %c0_13], %10 {strides = array<i32>} : memref<1x4x256xf32, #tpu.memory_space<vmem>>, vector<1x4x256xf32>,
    } else {
    }
    %c0 = arith.constant 0 : index
    %c0_1 = arith.constant 0 : index
    %c0_2 = arith.constant 0 : index
    %3 = vector.load %arg2[%c0, %c0_1, %c0_2] : memref<1x4x256xf32, #tpu.memory_space<vmem>>, vector<1x4x256xf32>
    %c0_3 = arith.constant 0 : index
    %c0_4 = arith.constant 0 : index
    %c0_5 = arith.constant 0 : index
    %4 = vector.load %arg6[%c0_3, %c0_4, %c0_5] : memref<1x4x256xf32, #tpu.memory_space<vmem>>, vector<1x4x256xf32>
    %5 = arith.addf %4, %3 : vector<1x4x256xf32>
    %c0_6 = arith.constant 0 : index
    %c0_7 = arith.constant 0 : index
    %c0_8 = arith.constant 0 : index
    %6 = vector.load %arg6[%c0_6, %c0_7, %c0_8] : memref<1x4x256xf32, #tpu.memory_space<vmem>>, vector<1x4x256xf32>
    tpu.vector_store %arg6[%c0_6, %c0_7, %c0_8], %5 {strides = array<i32>} : memref<1x4x256xf32, #tpu.memory_space<vmem>>, vector<1x4x256xf32>,
    %c0_i32_9 = arith.constant 0 : i32
    %7 = arith.cmpi eq, %arg1, %c0_i32_9 : i32
    %8 = arith.extui %7 : i1 to i32
    %c0_i32_10 = arith.constant 0 : i32
    %9 = arith.cmpi ne, %8, %c0_i32_10 : i32
    scf.if %9 {
      %c0_11 = arith.constant 0 : index
      %c0_12 = arith.constant 0 : index
      %c0_13 = arith.constant 0 : index
      %10 = vector.load %arg6[%c0_11, %c0_12, %c0_13] : memref<1x4x256xf32, #tpu.memory_space<vmem>>, vector<1x4x256xf32>
      %cst = arith.constant dense<0.000000e+00> : vector<1x4xf32>
      %11 = vector.multi_reduction <add>, %10, %cst [2] : vector<1x4x256xf32> to vector<1x4xf32>
      %cst_14 = arith.constant 3.906250e-03 : f32
      %12 = vector.broadcast %cst_14 : f32 to vector<1x4xf32>
      %13 = arith.mulf %11, %12 : vector<1x4xf32>
      %cst_15 = arith.constant 0.000000e+00 : f32
      %14 = vector.broadcast %cst_15 : f32 to vector<1x128xf32>
      %c0_16 = arith.constant 0 : index
      %c0_17 = arith.constant 0 : index
      %15 = vector.load %arg7[%c0_16, %c0_17] : memref<1x128xf32, #tpu.memory_space<vmem>>, vector<1x128xf32>
      tpu.vector_store %arg7[%c0_16, %c0_17], %14 {strides = array<i32>} : memref<1x128xf32, #tpu.memory_space<vmem>>, vector<1x128xf32>,
      %c0_18 = arith.constant 0 : index
      %c0_19 = arith.constant 0 : index
      %16 = vector.load %arg7[%c0_18, %c0_19] : memref<1x128xf32, #tpu.memory_space<vmem>>, vector<1x4xf32>
      tpu.vector_store %arg7[%c0_18, %c0_19], %13 {strides = array<i32>} : memref<1x128xf32, #tpu.memory_space<vmem>>, vector<1x4xf32>,
      %c0_20 = arith.constant 0 : index
      %c0_21 = arith.constant 0 : index
      %17 = vector.load %arg7[%c0_20, %c0_21] : memref<1x128xf32, #tpu.memory_space<vmem>>, vector<1x128xf32>
      %18 = arith.truncf %17 : vector<1x128xf32> to vector<1x128xbf16>
      %c0_22 = arith.constant 0 : index
      %c0_23 = arith.constant 0 : index
      %19 = vector.load %arg3[%c0_22, %c0_23] : memref<128x128xbf16, #tpu.memory_space<vmem>>, vector<128x128xbf16>
      %cst_24 = arith.constant dense<0.000000e+00> : vector<1x128xf32>
      %20 = tpu.matmul %18, %19, %cst_24 {dimension_numbers = #tpu.dot_dimension_numbers<[1], [0], [0], [1], [0, 0, 1, 1], [], []>} : vector<1x128xbf16>, vector<128x128xbf16>, vector<1x128xf32> -> vector<1x128xf32>
      %c0_25 = arith.constant 0 : index
      %c0_26 = arith.constant 0 : index
      %21 = vector.load %arg4[%c0_25, %c0_26] : memref<1x128xf32, #tpu.memory_space<vmem>>, vector<1x128xf32>
      %22 = arith.addf %20, %21 : vector<1x128xf32>
      %cst_27 = arith.constant 0.000000e+00 : f32
      %23 = vector.broadcast %cst_27 : f32 to vector<1x128xf32>
      %24 = arith.maximumf %22, %23 : vector<1x128xf32>
      %25 = arith.negf %24 : vector<1x128xf32>
      %26 = math.exp %25 : vector<1x128xf32>
      %cst_28 = arith.constant 1.000000e+00 : f32
      %27 = vector.broadcast %cst_28 : f32 to vector<1x128xf32>
      %28 = arith.addf %27, %26 : vector<1x128xf32>
      %29 = arith.divf %27, %28 : vector<1x128xf32>
      %30 = vector.shape_cast %29 : vector<1x128xf32> to vector<1x1x128xf32>
      %c0_29 = arith.constant 0 : index
      %c0_30 = arith.constant 0 : index
      %c0_31 = arith.constant 0 : index
      %31 = vector.load %arg5[%c0_29, %c0_30, %c0_31] : memref<1x1x128xf32, #tpu.memory_space<vmem>>, vector<1x1x128xf32>
      tpu.vector_store %arg5[%c0_29, %c0_30, %c0_31], %30 {strides = array<i32>} : memref<1x1x128xf32, #tpu.memory_space<vmem>>, vector<1x1x128xf32>,
    } else {
    }
    return
  }
  func.func @transform_0(%arg0: i32, %arg1: i32) -> (i32, i32, i32) {
    %c0_i32 = arith.constant 0 : i32
    %c0_i32_0 = arith.constant 0 : i32
    return %arg0, %c0_i32, %arg1 : i32, i32, i32
  }
  func.func @transform_1(%arg0: i32, %arg1: i32) -> (i32, i32) {
    %c0_i32 = arith.constant 0 : i32
    %c0_i32_0 = arith.constant 0 : i32
    %c0_i32_1 = arith.constant 0 : i32
    return %c0_i32, %c0_i32_0 : i32, i32
  }
  func.func @transform_2(%arg0: i32, %arg1: i32) -> (i32, i32) {
    %c0_i32 = arith.constant 0 : i32
    %c0_i32_0 = arith.constant 0 : i32
    %c0_i32_1 = arith.constant 0 : i32
    return %c0_i32, %c0_i32_0 : i32, i32
  }
  func.func @transform_3(%arg0: i32, %arg1: i32) -> (i32, i32, i32) {
    %c0_i32 = arith.constant 0 : i32
    %c0_i32_0 = arith.constant 0 : i32
    %c0_i32_1 = arith.constant 0 : i32
    return %arg0, %c0_i32, %c0_i32_0 : i32, i32, i32
  }
}

module attributes {stable_mosaic.version = 11 : i64} {
  func.func @_se_kernel(%arg0: i32, %arg1: i32, %arg2: memref<1x4x256xf32, #tpu.memory_space<vmem>>, %arg3: memref<128x128xbf16, #tpu.memory_space<vmem>>, %arg4: memref<1x128xf32, #tpu.memory_space<vmem>>, %arg5: memref<1x1x128xf32, #tpu.memory_space<vmem>>, %arg6: memref<1x4x256xf32, #tpu.memory_space<vmem>>, %arg7: memref<1x128xf32, #tpu.memory_space<vmem>>) attributes {dimension_semantics = [#tpu.dimension_semantics<parallel>, #tpu.dimension_semantics<arbitrary>], iteration_bounds = array<i64: 2, 1>, scalar_prefetch = 0 : i64, scratch_operands = 2 : i64, tpu.core_type = #tpu.core_type<tc>, window_params = [{transform_indices = @transform_0, window_bounds = array<i64: 1, 4, 256>}, {pipeline_mode = #tpu.pipeline_mode<synchronous>, transform_indices = @transform_1, window_bounds = array<i64: 128, 128>}, {pipeline_mode = #tpu.pipeline_mode<synchronous>, transform_indices = @transform_2, window_bounds = array<i64: 1, 128>}, {transform_indices = @transform_3, window_bounds = array<i64: 1, 1, 128>}]} {
    %c0_i32 = arith.constant 0 : i32
    %0 = arith.cmpi eq, %arg1, %c0_i32 : i32
    %1 = arith.extui %0 : i1 to i32
    %c0_i32_0 = arith.constant 0 : i32
    %2 = arith.cmpi ne, %1, %c0_i32_0 : i32
    scf.if %2 {
      %cst = arith.constant 0.000000e+00 : f32
      %10 = vector.broadcast %cst : f32 to vector<1x4x256xf32>
      %c0_11 = arith.constant 0 : index
      %c0_12 = arith.constant 0 : index
      %c0_13 = arith.constant 0 : index
      %11 = vector.load %arg6[%c0_11, %c0_12, %c0_13] : memref<1x4x256xf32, #tpu.memory_space<vmem>>, vector<1x4x256xf32>
      tpu.vector_store %arg6[%c0_11, %c0_12, %c0_13], %10 {strides = array<i32>} : memref<1x4x256xf32, #tpu.memory_space<vmem>>, vector<1x4x256xf32>,
    } else {
    }
    %c0 = arith.constant 0 : index
    %c0_1 = arith.constant 0 : index
    %c0_2 = arith.constant 0 : index
    %3 = vector.load %arg2[%c0, %c0_1, %c0_2] : memref<1x4x256xf32, #tpu.memory_space<vmem>>, vector<1x4x256xf32>
    %c0_3 = arith.constant 0 : index
    %c0_4 = arith.constant 0 : index
    %c0_5 = arith.constant 0 : index
    %4 = vector.load %arg6[%c0_3, %c0_4, %c0_5] : memref<1x4x256xf32, #tpu.memory_space<vmem>>, vector<1x4x256xf32>
    %5 = arith.addf %4, %3 : vector<1x4x256xf32>
    %c0_6 = arith.constant 0 : index
    %c0_7 = arith.constant 0 : index
    %c0_8 = arith.constant 0 : index
    %6 = vector.load %arg6[%c0_6, %c0_7, %c0_8] : memref<1x4x256xf32, #tpu.memory_space<vmem>>, vector<1x4x256xf32>
    tpu.vector_store %arg6[%c0_6, %c0_7, %c0_8], %5 {strides = array<i32>} : memref<1x4x256xf32, #tpu.memory_space<vmem>>, vector<1x4x256xf32>,
    %c0_i32_9 = arith.constant 0 : i32
    %7 = arith.cmpi eq, %arg1, %c0_i32_9 : i32
    %8 = arith.extui %7 : i1 to i32
    %c0_i32_10 = arith.constant 0 : i32
    %9 = arith.cmpi ne, %8, %c0_i32_10 : i32
    scf.if %9 {
      %c0_11 = arith.constant 0 : index
      %c0_12 = arith.constant 0 : index
      %c0_13 = arith.constant 0 : index
      %10 = vector.load %arg6[%c0_11, %c0_12, %c0_13] : memref<1x4x256xf32, #tpu.memory_space<vmem>>, vector<1x4x256xf32>
      %cst = arith.constant dense<0.000000e+00> : vector<1x4xf32>
      %11 = vector.multi_reduction <add>, %10, %cst [2] : vector<1x4x256xf32> to vector<1x4xf32>
      %cst_14 = arith.constant 3.906250e-03 : f32
      %12 = vector.broadcast %cst_14 : f32 to vector<1x4xf32>
      %13 = arith.mulf %11, %12 : vector<1x4xf32>
      %cst_15 = arith.constant 0.000000e+00 : f32
      %14 = vector.broadcast %cst_15 : f32 to vector<1x128xf32>
      %c0_16 = arith.constant 0 : index
      %c0_17 = arith.constant 0 : index
      %15 = vector.load %arg7[%c0_16, %c0_17] : memref<1x128xf32, #tpu.memory_space<vmem>>, vector<1x128xf32>
      tpu.vector_store %arg7[%c0_16, %c0_17], %14 {strides = array<i32>} : memref<1x128xf32, #tpu.memory_space<vmem>>, vector<1x128xf32>,
      %c0_18 = arith.constant 0 : index
      %c0_19 = arith.constant 0 : index
      %16 = vector.load %arg7[%c0_18, %c0_19] : memref<1x128xf32, #tpu.memory_space<vmem>>, vector<1x4xf32>
      tpu.vector_store %arg7[%c0_18, %c0_19], %13 {strides = array<i32>} : memref<1x128xf32, #tpu.memory_space<vmem>>, vector<1x4xf32>,
      %c0_20 = arith.constant 0 : index
      %c0_21 = arith.constant 0 : index
      %17 = vector.load %arg7[%c0_20, %c0_21] : memref<1x128xf32, #tpu.memory_space<vmem>>, vector<1x128xf32>
      %18 = arith.truncf %17 : vector<1x128xf32> to vector<1x128xbf16>
      %c0_22 = arith.constant 0 : index
      %c0_23 = arith.constant 0 : index
      %19 = vector.load %arg3[%c0_22, %c0_23] : memref<128x128xbf16, #tpu.memory_space<vmem>>, vector<128x128xbf16>
      %cst_24 = arith.constant dense<0.000000e+00> : vector<1x128xf32>
      %20 = tpu.matmul %18, %19, %cst_24 {dimension_numbers = #tpu.dot_dimension_numbers<[1], [0], [0], [1], [0, 0, 1, 1], [], []>} : vector<1x128xbf16>, vector<128x128xbf16>, vector<1x128xf32> -> vector<1x128xf32>
      %c0_25 = arith.constant 0 : index
      %c0_26 = arith.constant 0 : index
      %21 = vector.load %arg4[%c0_25, %c0_26] : memref<1x128xf32, #tpu.memory_space<vmem>>, vector<1x128xf32>
      %22 = arith.addf %20, %21 : vector<1x128xf32>
      %cst_27 = arith.constant 0.000000e+00 : f32
      %23 = vector.broadcast %cst_27 : f32 to vector<1x128xf32>
      %24 = arith.maximumf %22, %23 : vector<1x128xf32>
      %25 = arith.negf %24 : vector<1x128xf32>
      %26 = math.exp %25 : vector<1x128xf32>
      %cst_28 = arith.constant 1.000000e+00 : f32
      %27 = vector.broadcast %cst_28 : f32 to vector<1x128xf32>
      %28 = arith.addf %27, %26 : vector<1x128xf32>
      %29 = arith.divf %27, %28 : vector<1x128xf32>
      %30 = vector.shape_cast %29 : vector<1x128xf32> to vector<1x1x128xf32>
      %c0_29 = arith.constant 0 : index
      %c0_30 = arith.constant 0 : index
      %c0_31 = arith.constant 0 : index
      %31 = vector.load %arg5[%c0_29, %c0_30, %c0_31] : memref<1x1x128xf32, #tpu.memory_space<vmem>>, vector<1x1x128xf32>
      tpu.vector_store %arg5[%c0_29, %c0_30, %c0_31], %30 {strides = array<i32>} : memref<1x1x128xf32, #tpu.memory_space<vmem>>, vector<1x1x128xf32>,
    } else {
    }
    return
  }
  func.func @transform_0(%arg0: i32, %arg1: i32) -> (i32, i32, i32) {
    %c0_i32 = arith.constant 0 : i32
    %c0_i32_0 = arith.constant 0 : i32
    return %arg0, %c0_i32, %arg1 : i32, i32, i32
  }
  func.func @transform_1(%arg0: i32, %arg1: i32) -> (i32, i32) {
    %c0_i32 = arith.constant 0 : i32
    %c0_i32_0 = arith.constant 0 : i32
    %c0_i32_1 = arith.constant 0 : i32
    return %c0_i32, %c0_i32_0 : i32, i32
  }
  func.func @transform_2(%arg0: i32, %arg1: i32) -> (i32, i32) {
    %c0_i32 = arith.constant 0 : i32
    %c0_i32_0 = arith.constant 0 : i32
    %c0_i32_1 = arith.constant 0 : i32
    return %c0_i32, %c0_i32_0 : i32, i32
  }
  func.func @transform_3(%arg0: i32, %arg1: i32) -> (i32, i32, i32) {
    %c0_i32 = arith.constant 0 : i32
    %c0_i32_0 = arith.constant 0 : i32
    %c0_i32_1 = arith.constant 0 : i32
    return %arg0, %c0_i32, %c0_i32_0 : i32, i32, i32
  }
}

</mosaic_0001>

<bundles_post_ra>
// kernel: tpu_custom_call.1
= control target key start
LH: loop header
LB: loop body
LE: loop exit
PB: predicated region body
PF: predicated region fallthrough
CT: control target
= control target key end

     0   :  { %8 = vsyncpa [#allocation5], 0  ;;  %s1002_s0 = inlined_call_operand.hbm [shape: f32[2,4,256], index: 0, kind: input, shape index: {}]   ;;  %s1003_s1 = inlined_call_operand.hbm [shape: bf16[128,128], index: 1, kind: input, shape index: {}]   ;;  %s1004_s2 = inlined_call_operand.vmem [shape: f32[1,128], index: 2, kind: input, shape index: {}]   ;;  %s1005_s3 = inlined_call_operand.hbm [shape: f32[2,1,128], index: 3, kind: output, shape index: {}]  }
   0x1   :  { %10 = vsyncpa [#allocation5 + $0x1], 0 }
   0x2   :  { %11 = vsyncpa [#allocation8], 0 }
   0x3   :  { %12 = vsyncpa [#allocation6], 0 }
   0x4   :  { %14 = vsyncpa [#allocation6 + $0x1], 0  ;;  %s784_s12 = smov 0   ;;  %s786_s13 = smov 0  }
   0x5   :  { %s788_s14 = smov 0   ;;  %s790_s15 = smov 0  }
   0x6   :  { %s792_s16 = smov 0   ;;  %s794_s17 = smov 0  }
   0x7 LB: > { %s468_s18 = sadd.s32 4294967295, %s755_s17   ;;  %s469_s19 = sadd.s32 4294967294, %s755_s17   ;;  %s755_s17 = sphi %s794_s17, %s20_s17   ;;  %s751_s16 = sphi %s792_s16, %s1029_s16   ;;  %s747_s15 = sphi %s790_s15, %s1028_s15   ;;  %s743_s14 = sphi %s788_s14, %s1027_s14   ;;  %s739_s13 = sphi %s786_s13, %s1026_s13   ;;  %s735_s12 = sphi %s784_s12, %s1025_s12  }
   0x8   : > { %p54_p0 = scmp.ne.s32.totalorder %s739_s13, %s735_s12  ;;  %p818_p1 = scmp.eq.s32.totalorder %s468_s18, 0 }
   0x9   : > { %p822_p2 = scmp.eq.s32.totalorder %s468_s18, 1  ;;  %p126_p3 = scmp.eq.s32.totalorder %s469_s19, 1 }
   0xa   : > { %s1010_s20 = scalar_select %p818_p1, 1, 0 }
   0xb   : > { %s1011_s21 = scalar_select %p822_p2, 1, 0 }
   0xc   : > { %p828_p4 = por %p818_p1, %p54_p0  ;;  %p470_p5 = scmp.ge.s32.totalorder %s755_s17, 1 }
   0xd   : > { %p833_p6 = por %p126_p3, %p54_p0  ;;  %p133_p7 = scmp.lt.s32.totalorder %s755_s17, 3 }
   0xe   : > { %s1012_s22 = scalar_select %p828_p4, 1, 0 }
   0xf   : > { %s1013_s23 = scalar_select %p833_p6, 1, 0 }
  0x10   : > { %p838_p8 = pnand %p470_p5, %p133_p7  ;;  %s757_s25 = smov [#allocation7]  }
  0x11   : > { %s145_s26 = sshll.u32 %s757_s25, 4  ;;  %s32_s28 = sadd.s32 1, %s751_s16  ;;  %s146_s26 = int_to_ptr.vmem [resolvable:$true] %s145_s26 }
  0x12   : > { %s1014_s24 = scalar_select %p838_p8, 1, 0 }
  0x13   : > { %p529_p9 = pneg %p838_p8  ;;  %s611_s4 = scalar_lea.hbm %s1003_s1, 1024 }
  0x14   : > { %p612_p12 = scmp.ne.s32.totalorder %s1003_s1, %s611_s4  ;;  %p618_p5 = scmp.lt.u32.totalorder %s611_s4, %s1003_s1 }
  0x15   : > { %p847_p11 = pnand %p529_p9, %p818_p1 }
  0x17   : > { %p613_p13 = pneg %p847_p11 }
  0x19   : > { %p614_p0 = pnand %p613_p13, %p612_p12 }
  0x1b   : > { %p615_p3 = pneg %p614_p0 }
  0x1d   : > { %p620_p7 = pnand %p618_p5, %p615_p3 }
  0x1f   : > { %623 = shalt.err (!%p620_p7)
}
  0x20   : > { %s624_s9 = scalar_lea.vmem %s146_s26, 1024  ;;  %p632_p1 = scmp.lt.s32.totalorder %s146_s26, %s146_s26 }
  0x21   : > { %p625_p9 = scmp.ne.s32.totalorder %s146_s26, %s624_s9  ;;  %p633_p4 = scmp.lt.s32.totalorder %s624_s9, %s624_s9 }
  0x23   : > { %p627_p10 = pnand %p625_p9, %p613_p13  ;;  %p634_p8 = por %p633_p4, %p632_p1 }
  0x25   : > { %p628_p6 = pneg %p627_p10 }
  0x27   : > { %p635_p2 = pnand %p634_p8, %p628_p6 }
  0x29   : > { %638 = shalt.err (!%p635_p2)
}
  0x2a   : > { %s758_s10 = smov 64   ;;  %s759_s11 = smov 4  }
  0x2b   : > { %532 = dma.hbm_to_vmem [thread:$0]  (!%p847_p11), %s1003_s1, 1024, %s146_s26, [#allocation8], %s758_s10, %s758_s10, %s759_s11  }
  0x2c   : > { %p34_p1 = scmp.ge.s32.totalorder %s32_s28, 2  ;;  %s41_s25 = sadd.s32 1, %s743_s14 }
  0x2d   : > { %p48_p2 = scmp.ne.s32.totalorder %s743_s14, %s739_s13  ;;  %p49_p4 = scmp.eq.s32.totalorder %s755_s17, 0 }
  0x2e   : > { %s1031_s28 = smov (%p34_p1, %s32_s28), 0  ;;  %p1017_p8 = scmp.ne.s32.totalorder %s1011_s21, 0 }
  0x2f   : > { %p874_p6 = por %p49_p4, %p48_p2  ;;  %s36_s27 = ssub.s32 %s751_s16, %s1031_s28 }
  0x30   : > { %p880_p10 = por %p1017_p8, %p48_p2  ;;  %p542_p12 = scmp.lt.s32.totalorder %s755_s17, 2 }
  0x31   : > { %p39_p11 = scmp.eq.s32.totalorder %s36_s27, 0  ;;  %s162_s26 = sand.u32 1, %s743_s14  }
  0x32   : > { %s473_s4 = sshll.u32 %s162_s26, 3  ;;  %s491_s6 = sshll.u32 %s751_s16, 7 }
  0x33   : > { %s889_s5 = scalar_select %p39_p11, %s743_s14, %s41_s25  }
  0x34   : > { %s895_s9 = scalar_lea.hbm %s1002_s0, %s491_s6  ;;  %s166_s21 = scalar_lea.vmem [#allocation4], %s473_s4 }
  0x35   : > { %s176_s10 = sshll.u32 %s166_s21, 4  ;;  %p901_p13 = pnand %p542_p12, %p874_p6  ;;  %s897_s10 = int_to_ptr.vmem [resolvable:$true] %s176_s10 }
  0x36   : > { %s163_s18 = scalar_lea.sflag [#allocation5], %s162_s26  ;;  %s639_s19 = scalar_lea.hbm %s895_s9, 128 }
  0x37   : > { %p640_p0 = scmp.ne.s32.totalorder %s895_s9, %s639_s19  ;;  %p641_p3 = pneg %p901_p13 }
  0x38   : > { %s644_s4 = scalar_lea.hbm %s1002_s0, 256  ;;  %p645_p9 = scmp.lt.u32.totalorder %s895_s9, %s1002_s0 }
  0x39   : > { %p642_p5 = pnand %p641_p3, %p640_p0  ;;  %p646_p1 = scmp.lt.u32.totalorder %s644_s4, %s639_s19 }
  0x3a   : > { %p648_p4 = scmp.lt.u32.totalorder %s639_s19, %s895_s9 }
  0x3b   : > { %p643_p7 = pneg %p642_p5  ;;  %p647_p2 = por %p646_p1, %p645_p9 }
  0x3d   : > { %p649_p6 = por %p648_p4, %p647_p2 }
  0x3f   : > { %p650_p8 = pnand %p649_p6, %p643_p7 }
  0x41   : > { %653 = shalt.err (!%p650_p8)
}
  0x42   : > { %s654_s26 = scalar_lea.vmem %s897_s10, 128  ;;  %s760_s7 = smov [#allocation4]  }
  0x43   : > { %p655_p12 = scmp.ne.s32.totalorder %s897_s10, %s654_s26  ;;  %s659_s8 = sshll.u32 %s760_s7, 4  ;;  %s660_s8 = int_to_ptr.vmem [resolvable:$false] %s659_s8 }
  0x44   : > { %s661_s21 = scalar_lea.vmem %s660_s8, 256  ;;  %p662_p5 = scmp.lt.s32.totalorder %s897_s10, %s660_s8 }
  0x45   : > { %p657_p11 = pnand %p655_p12, %p641_p3  ;;  %p663_p9 = scmp.lt.s32.totalorder %s661_s21, %s654_s26 }
  0x47   : > { %p658_p0 = pneg %p657_p11  ;;  %p664_p1 = por %p663_p9, %p662_p5 }
  0x49   : > { %p665_p2 = pnand %p664_p1, %p658_p0 }
  0x4b   : > { %668 = shalt.err (!%p665_p2)
}
  0x4c   : > { %536 = dma.hbm_to_vmem [thread:$0]  (!%p901_p13), %s895_s9, 128, %s897_s10, %s163_s18  }
  0x4d   : > { %p1020_p7 = scmp.ne.s32.totalorder %s1014_s24, 0 }
  0x4e   : > { %s933_s19 = sand.u32 (!%p1020_p7), 1, %s739_s13   ;;  %p1021_p3 = scmp.ne.s32.totalorder (!%p1020_p7), %s1012_s22, 0 }
  0x4f   : > { %185 = sbr.rel (%p1020_p7) target bundleno = 508 (0x1fc), region = 32  ;;  %s477_s25 = sshll.u32 (!%p1020_p7), %s933_s19, 3 }
  0x50   : > { %s188_s27 = scalar_lea.sflag (!%p1020_p7), [#allocation5], %s933_s19  ;;  %s191_s4 = scalar_lea.vmem (!%p1020_p7), [#allocation4], %s477_s25 }
  0x56   : > { %722 = dma.done.wait (%p1021_p3), %s188_s27, 128  }
  0x57   : > { %724 = vsyncadd (%p1021_p3), %s188_s27, 4294967168  ;;  %p1022_p4 = scmp.ne.s32.totalorder %s1010_s20, 0 }
  0x59   : > { %726 = dma.done.wait (%p1022_p4), [#allocation8], 1024  }
  0x5a   : > { %728 = vsyncadd (%p1022_p4), [#allocation8], 4294966272  ;;  %v761_v0 = vmov 0.0   ;;  %vm235_vm0 = vcmask 1043456   ;;  %v224_v1 = vld [vmem:[%s191_s4] sm:$0xff]  ;;  %v599_v4 = vld [vmem:[#allocation7] sm:$0xff]   ;;  %v244_v14 = vlaneseq }
  0x5b   : > { %501 = vmatprep.subr.bf16.mxu0 %v761_v0  ;;  %242 = vst [vmem:[#allocation3] sm:$0x1] %v761_v0  ;;  %v233_v2 = vcombine.high %v224_v1, %v224_v1  ;;  %v236_v3 = vsel %vm235_vm0, %v224_v1, 0.0  ;;  %v600_v6 = vld [vmem:[#allocation7 + $0x8] sm:$0xff]   ;;  %v601_v8 = vld [vmem:[#allocation7 + $0x10] sm:$0xff]   ;;  %v602_v9 = vld [vmem:[#allocation7 + $0x18] sm:$0xff]  }
  0x5c   : > { %502 = vmatpush3.bf16.msra.mxu0 %v599_v4  ;;  %v603_v10 = vld [vmem:[#allocation7 + $0x20] sm:$0xff]   ;;  %v604_v11 = vld [vmem:[#allocation7 + $0x28] sm:$0xff]   ;;  %v605_v12 = vld [vmem:[#allocation7 + $0x30] sm:$0xff]   ;;  %vm762_vm1 = vmmov 0   ;;  %v245_v15 = vand.u32 127, %v244_v14  ;;  %v247_v16 = vshrl.u32 %v244_v14, 7 }
  0x5d   : > { %v237_v5 = vsel %vm235_vm0, %v233_v2, 0.0  ;;  %503 = vmatprep.subr.bf16.mxu0 %v761_v0  ;;  %517 = vmatprep.mubr.msk.bf16.mxu0 %vm762_vm1, %v761_v0  ;;  %v606_v13 = vld [vmem:[#allocation7 + $0x38] sm:$0xff]   ;;  %vm251_vm2 = vcmask 24576   ;;  %v271_v23 = vld [vmem:[%s1004_s2] sm:$0x1]  ;;  %s488_s24 = sshll.u32 %s747_s15, 4 }
  0x5e   : > { %v238_v7 = vadd.f32 %v237_v5, %v236_v3  ;;  %v248_v17 = vsub.s32 %v245_v15, %v247_v16  ;;  %s216_s9 = scalar_lea.vmem [#allocation9], %s933_s19  ;;  %s953_s29 = scalar_lea.hbm %s1005_s3, %s488_s24 }
  0x5f   : > { %s381_s10 = sshll.u32 %s216_s9, 4  ;;  %s369_s6 = scalar_lea.sflag [#allocation6], %s933_s19  ;;  %s955_s10 = int_to_ptr.vmem [resolvable:$true] %s381_s10 }
  0x60   : > { %239 = vadd.xlane.f32.xlu0 %v238_v7  ;;  %504 = vmatpush3.bf16.msra.mxu0 %v600_v6  ;;  %s669_s26 = scalar_lea.vmem %s955_s10, 16  ;;  %s763_s15 = smov [#allocation9]  }
  0x61   : > { %505 = vmatprep.subr.bf16.mxu0 %v761_v0  ;;  %p670_p13 = scmp.ne.s32.totalorder %s955_s10, %s669_s26  ;;  %s673_s7 = sshll.u32 %s763_s15, 4  ;;  %s674_s7 = int_to_ptr.vmem [resolvable:$false] %s673_s7 }
  0x62   : > { %s675_s8 = scalar_lea.vmem %s674_s7, 32  ;;  %p676_p12 = scmp.lt.s32.totalorder %s955_s10, %s674_s7 }
  0x63   : > { %p671_p6 = pnand %p670_p13, %p880_p10  ;;  %p677_p11 = scmp.lt.s32.totalorder %s675_s8, %s669_s26 }
  0x64   : > { %506 = vmatpush3.bf16.msra.mxu0 %v601_v8 }
  0x65   : > { %507 = vmatprep.subr.bf16.mxu0 %v761_v0  ;;  %p672_p8 = pneg %p671_p6  ;;  %p678_p0 = por %p677_p11, %p676_p12 }
  0x67   : > { %p679_p5 = pnand %p678_p0, %p672_p8 }
  0x68   : > { %508 = vmatpush3.bf16.msra.mxu0 %v602_v9 }
  0x69   : > { %509 = vmatprep.subr.bf16.mxu0 %v761_v0 }
  0x6c   : > { %510 = vmatpush3.bf16.msra.mxu0 %v603_v10 }
  0x6d   : > { %511 = vmatprep.subr.bf16.mxu0 %v761_v0 }
  0x70   : > { %512 = vmatpush3.bf16.msra.mxu0 %v604_v11 }
  0x71   : > { %513 = vmatprep.subr.bf16.mxu0 %v761_v0 }
  0x74   : > { %514 = vmatpush3.bf16.msra.mxu0 %v605_v12 }
  0x75   : > { %515 = vmatprep.subr.bf16.mxu0 %v761_v0 }
  0x78   : > { %516 = vmatpush3.bf16.msra.mxu0 %v606_v13 }
  0xed   : > { %v240_v18 = vpop.xlane.xlu0 %239 }
  0xee   : > { %v241_v19 = vmul.f32 0.00390625, %v240_v18 }
  0xf0   : > { %v249_v20 = vrot.slane %v241_v19, %v248_v17 }
  0xf2   : > { %252 = vst.msk [vmem:[#allocation3] sm:$0x1] %vm251_vm2, %v249_v20 }
  0xf9   : > { %v253_v21 = vld [vmem:[#allocation3] sm:$0x1] }
  0xfa   : > { %v254_v22 = vpack.c.bf16 %v253_v21, %v253_v21 }
  0xfc   : > { %518 = vmatmul.mubr.bf16.vlgmr.msra.gmra.mrb[0].mxu0 %v254_v22 }
 0x1cf   : > { %v354_v24 = vpop.f32.mrb[0].mxu0 }
 0x1d0   : > { %v355_v25 = vadd.f32 %v354_v24, %v271_v23  ;;  %v519_v26 = vpop.f32.mrb[1].mxu0 }
 0x1d1   : > { %v357_v27 = vpop.f32.mrb[2].mxu0 }
 0x1d2   : > { %v360_v28 = vmax.f32 %v355_v25, 0.0  ;;  %v520_v29 = vpop.f32.mrb[3].mxu0 }
 0x1d4   : > { %v487_v30 = vmul.f32 -1.442695, %v360_v28 }
 0x1d6   : > { %607 = vpow2.f32 %v487_v30 }
 0x1e0   : > { %v608_v31 = vpop.eup %607 }
 0x1e1   : > { %v364_v32 = vadd.f32 1.0, %v608_v31 }
 0x1e3   : > { %609 = vrcp.f32 %v364_v32 }
 0x1ed   : > { %v610_v33 = vpop.eup %609 }
 0x1ee   : > { %367 = vst [vmem:[%s216_s9] sm:$0x1] %v610_v33 }
 0x1ef   : > { %682 = shalt.err (!%p679_p5)
}
 0x1f0   : > { %s683_s21 = scalar_lea.hbm %s953_s29, 16  ;;  %s687_s27 = scalar_lea.hbm %s1005_s3, 32 }
 0x1f1   : > { %p684_p9 = scmp.ne.s32.totalorder %s953_s29, %s683_s21  ;;  %p688_p7 = scmp.lt.u32.totalorder %s953_s29, %s1005_s3 }
 0x1f2   : > { %p689_p3 = scmp.lt.u32.totalorder %s687_s27, %s683_s21  ;;  %p691_p13 = scmp.lt.u32.totalorder %s683_s21, %s953_s29 }
 0x1f3   : > { %p685_p1 = pnand %p684_p9, %p880_p10 }
 0x1f4   : > { %p690_p4 = por %p689_p3, %p688_p7 }
 0x1f5   : > { %p686_p2 = pneg %p685_p1 }
 0x1f6   : > { %p692_p6 = por %p691_p13, %p690_p4 }
 0x1f8   : > { %p693_p8 = pnand %p692_p6, %p686_p2 }
 0x1fa   : > { %696 = shalt.err (!%p693_p8)
}
 0x1fb   : > { %527 = dma.vmem_to_hbm [thread:$0]  (%p880_p10), %s955_s10, 16, %s953_s29, %s369_s6  }
 0x1fc PF: > { %s393_s22 = sand.u32 1, %s735_s12   ;;  %p1023_p12 = scmp.ne.s32.totalorder %s1013_s23, 0 }
 0x1fd   : > { %p1024_p11 = scmp.ge.s32.totalorder %s755_s17, 2  ;;  %s394_s24 = scalar_lea.sflag [#allocation6], %s393_s22 }
 0x1ff   : > { %p538_p0 = pnand %p1024_p11, %p1023_p12 }
 0x201   : > { %730 = dma.done.wait (!%p538_p0), %s394_s24, 16  }
 0x202   : > { %732 = vsyncadd (!%p538_p0), %s394_s24, 4294967280  ;;  %s20_s17 = sadd.s32 1, %s755_s17   ;;  %s1025_s12 = smov %s739_s13 }
 0x203   : > { %p17_p5 = scmp.ge.s32.totalorder %s20_s17, 4   ;;  %s1026_s13 = smov %s743_s14 }
 0x204   : > { %s1027_s14 = smov %s889_s5  ;;  %s1028_s15 = smov %s751_s16 }
 0x205   : > { %s1029_s16 = smov %s1031_s28  ;;  %19 = sbr.rel (!%p17_p5) target bundleno = 7 (0x7), region = 89 }
 0x20c   :  { %398 = vsyncpa [#allocation5], 1 }
 0x20d   :  { %400 = vsyncpa [#allocation5 + $0x1], 1 }
 0x20e   :  { %401 = vsyncpa [#allocation8], 1 }
 0x20f   :  { %402 = vsyncpa [#allocation6], 1 }
 0x210   :  { %404 = vsyncpa [#allocation6 + $0x1], 1 }

// kernel: tpu_custom_call.1
= control target key start
LH: loop header
LB: loop body
LE: loop exit
PB: predicated region body
PF: predicated region fallthrough
CT: control target
= control target key end

     0   :  { %8 = vsyncpa [#allocation5], 0  ;;  %s1002_s0 = inlined_call_operand.hbm [shape: f32[2,4,256], index: 0, kind: input, shape index: {}]   ;;  %s1003_s1 = inlined_call_operand.hbm [shape: bf16[128,128], index: 1, kind: input, shape index: {}]   ;;  %s1004_s2 = inlined_call_operand.vmem [shape: f32[1,128], index: 2, kind: input, shape index: {}]   ;;  %s1005_s3 = inlined_call_operand.hbm [shape: f32[2,1,128], index: 3, kind: output, shape index: {}]  }
   0x1   :  { %10 = vsyncpa [#allocation5 + $0x1], 0 }
   0x2   :  { %11 = vsyncpa [#allocation8], 0 }
   0x3   :  { %12 = vsyncpa [#allocation6], 0 }
   0x4   :  { %14 = vsyncpa [#allocation6 + $0x1], 0  ;;  %s784_s12 = smov 0   ;;  %s786_s13 = smov 0  }
   0x5   :  { %s788_s14 = smov 0   ;;  %s790_s15 = smov 0  }
   0x6   :  { %s792_s16 = smov 0   ;;  %s794_s17 = smov 0  }
   0x7 LB: > { %s468_s18 = sadd.s32 4294967295, %s755_s17   ;;  %s469_s19 = sadd.s32 4294967294, %s755_s17   ;;  %s755_s17 = sphi %s794_s17, %s20_s17   ;;  %s751_s16 = sphi %s792_s16, %s1029_s16   ;;  %s747_s15 = sphi %s790_s15, %s1028_s15   ;;  %s743_s14 = sphi %s788_s14, %s1027_s14   ;;  %s739_s13 = sphi %s786_s13, %s1026_s13   ;;  %s735_s12 = sphi %s784_s12, %s1025_s12  }
   0x8   : > { %p54_p0 = scmp.ne.s32.totalorder %s739_s13, %s735_s12  ;;  %p818_p1 = scmp.eq.s32.totalorder %s468_s18, 0 }
   0x9   : > { %p822_p2 = scmp.eq.s32.totalorder %s468_s18, 1  ;;  %p126_p3 = scmp.eq.s32.totalorder %s469_s19, 1 }
   0xa   : > { %s1010_s20 = scalar_select %p818_p1, 1, 0 }
   0xb   : > { %s1011_s21 = scalar_select %p822_p2, 1, 0 }
   0xc   : > { %p828_p4 = por %p818_p1, %p54_p0  ;;  %p470_p5 = scmp.ge.s32.totalorder %s755_s17, 1 }
   0xd   : > { %p833_p6 = por %p126_p3, %p54_p0  ;;  %p133_p7 = scmp.lt.s32.totalorder %s755_s17, 3 }
   0xe   : > { %s1012_s22 = scalar_select %p828_p4, 1, 0 }
   0xf   : > { %s1013_s23 = scalar_select %p833_p6, 1, 0 }
  0x10   : > { %p838_p8 = pnand %p470_p5, %p133_p7  ;;  %s757_s25 = smov [#allocation7]  }
  0x11   : > { %s145_s26 = sshll.u32 %s757_s25, 4  ;;  %s32_s28 = sadd.s32 1, %s751_s16  ;;  %s146_s26 = int_to_ptr.vmem [resolvable:$true] %s145_s26 }
  0x12   : > { %s1014_s24 = scalar_select %p838_p8, 1, 0 }
  0x13   : > { %p529_p9 = pneg %p838_p8  ;;  %s611_s4 = scalar_lea.hbm %s1003_s1, 1024 }
  0x14   : > { %p612_p12 = scmp.ne.s32.totalorder %s1003_s1, %s611_s4  ;;  %p618_p5 = scmp.lt.u32.totalorder %s611_s4, %s1003_s1 }
  0x15   : > { %p847_p11 = pnand %p529_p9, %p818_p1 }
  0x17   : > { %p613_p13 = pneg %p847_p11 }
  0x19   : > { %p614_p0 = pnand %p613_p13, %p612_p12 }
  0x1b   : > { %p615_p3 = pneg %p614_p0 }
  0x1d   : > { %p620_p7 = pnand %p618_p5, %p615_p3 }
  0x1f   : > { %623 = shalt.err (!%p620_p7)
}
  0x20   : > { %s624_s9 = scalar_lea.vmem %s146_s26, 1024  ;;  %p632_p1 = scmp.lt.s32.totalorder %s146_s26, %s146_s26 }
  0x21   : > { %p625_p9 = scmp.ne.s32.totalorder %s146_s26, %s624_s9  ;;  %p633_p4 = scmp.lt.s32.totalorder %s624_s9, %s624_s9 }
  0x23   : > { %p627_p10 = pnand %p625_p9, %p613_p13  ;;  %p634_p8 = por %p633_p4, %p632_p1 }
  0x25   : > { %p628_p6 = pneg %p627_p10 }
  0x27   : > { %p635_p2 = pnand %p634_p8, %p628_p6 }
  0x29   : > { %638 = shalt.err (!%p635_p2)
}
  0x2a   : > { %s758_s10 = smov 64   ;;  %s759_s11 = smov 4  }
  0x2b   : > { %532 = dma.hbm_to_vmem [thread:$0]  (!%p847_p11), %s1003_s1, 1024, %s146_s26, [#allocation8], %s758_s10, %s758_s10, %s759_s11  }
  0x2c   : > { %p34_p1 = scmp.ge.s32.totalorder %s32_s28, 2  ;;  %s41_s25 = sadd.s32 1, %s743_s14 }
  0x2d   : > { %p48_p2 = scmp.ne.s32.totalorder %s743_s14, %s739_s13  ;;  %p49_p4 = scmp.eq.s32.totalorder %s755_s17, 0 }
  0x2e   : > { %s1031_s28 = smov (%p34_p1, %s32_s28), 0  ;;  %p1017_p8 = scmp.ne.s32.totalorder %s1011_s21, 0 }
  0x2f   : > { %p874_p6 = por %p49_p4, %p48_p2  ;;  %s36_s27 = ssub.s32 %s751_s16, %s1031_s28 }
  0x30   : > { %p880_p10 = por %p1017_p8, %p48_p2  ;;  %p542_p12 = scmp.lt.s32.totalorder %s755_s17, 2 }
  0x31   : > { %p39_p11 = scmp.eq.s32.totalorder %s36_s27, 0  ;;  %s162_s26 = sand.u32 1, %s743_s14  }
  0x32   : > { %s473_s4 = sshll.u32 %s162_s26, 3  ;;  %s491_s6 = sshll.u32 %s751_s16, 7 }
  0x33   : > { %s889_s5 = scalar_select %p39_p11, %s743_s14, %s41_s25  }
  0x34   : > { %s895_s9 = scalar_lea.hbm %s1002_s0, %s491_s6  ;;  %s166_s21 = scalar_lea.vmem [#allocation4], %s473_s4 }
  0x35   : > { %s176_s10 = sshll.u32 %s166_s21, 4  ;;  %p901_p13 = pnand %p542_p12, %p874_p6  ;;  %s897_s10 = int_to_ptr.vmem [resolvable:$true] %s176_s10 }
  0x36   : > { %s163_s18 = scalar_lea.sflag [#allocation5], %s162_s26  ;;  %s639_s19 = scalar_lea.hbm %s895_s9, 128 }
  0x37   : > { %p640_p0 = scmp.ne.s32.totalorder %s895_s9, %s639_s19  ;;  %p641_p3 = pneg %p901_p13 }
  0x38   : > { %s644_s4 = scalar_lea.hbm %s1002_s0, 256  ;;  %p645_p9 = scmp.lt.u32.totalorder %s895_s9, %s1002_s0 }
  0x39   : > { %p642_p5 = pnand %p641_p3, %p640_p0  ;;  %p646_p1 = scmp.lt.u32.totalorder %s644_s4, %s639_s19 }
  0x3a   : > { %p648_p4 = scmp.lt.u32.totalorder %s639_s19, %s895_s9 }
  0x3b   : > { %p643_p7 = pneg %p642_p5  ;;  %p647_p2 = por %p646_p1, %p645_p9 }
  0x3d   : > { %p649_p6 = por %p648_p4, %p647_p2 }
  0x3f   : > { %p650_p8 = pnand %p649_p6, %p643_p7 }
  0x41   : > { %653 = shalt.err (!%p650_p8)
}
  0x42   : > { %s654_s26 = scalar_lea.vmem %s897_s10, 128  ;;  %s760_s7 = smov [#allocation4]  }
  0x43   : > { %p655_p12 = scmp.ne.s32.totalorder %s897_s10, %s654_s26  ;;  %s659_s8 = sshll.u32 %s760_s7, 4  ;;  %s660_s8 = int_to_ptr.vmem [resolvable:$false] %s659_s8 }
  0x44   : > { %s661_s21 = scalar_lea.vmem %s660_s8, 256  ;;  %p662_p5 = scmp.lt.s32.totalorder %s897_s10, %s660_s8 }
  0x45   : > { %p657_p11 = pnand %p655_p12, %p641_p3  ;;  %p663_p9 = scmp.lt.s32.totalorder %s661_s21, %s654_s26 }
  0x47   : > { %p658_p0 = pneg %p657_p11  ;;  %p664_p1 = por %p663_p9, %p662_p5 }
  0x49   : > { %p665_p2 = pnand %p664_p1, %p658_p0 }
  0x4b   : > { %668 = shalt.err (!%p665_p2)
}
  0x4c   : > { %536 = dma.hbm_to_vmem [thread:$0]  (!%p901_p13), %s895_s9, 128, %s897_s10, %s163_s18  }
  0x4d   : > { %p1020_p7 = scmp.ne.s32.totalorder %s1014_s24, 0 }
  0x4e   : > { %s933_s19 = sand.u32 (!%p1020_p7), 1, %s739_s13   ;;  %p1021_p3 = scmp.ne.s32.totalorder (!%p1020_p7), %s1012_s22, 0 }
  0x4f   : > { %185 = sbr.rel (%p1020_p7) target bundleno = 508 (0x1fc), region = 32  ;;  %s477_s25 = sshll.u32 (!%p1020_p7), %s933_s19, 3 }
  0x50   : > { %s188_s27 = scalar_lea.sflag (!%p1020_p7), [#allocation5], %s933_s19  ;;  %s191_s4 = scalar_lea.vmem (!%p1020_p7), [#allocation4], %s477_s25 }
  0x56   : > { %722 = dma.done.wait (%p1021_p3), %s188_s27, 128  }
  0x57   : > { %724 = vsyncadd (%p1021_p3), %s188_s27, 4294967168  ;;  %p1022_p4 = scmp.ne.s32.totalorder %s1010_s20, 0 }
  0x59   : > { %726 = dma.done.wait (%p1022_p4), [#allocation8], 1024  }
  0x5a   : > { %728 = vsyncadd (%p1022_p4), [#allocation8], 4294966272  ;;  %v761_v0 = vmov 0.0   ;;  %vm235_vm0 = vcmask 1043456   ;;  %v224_v1 = vld [vmem:[%s191_s4] sm:$0xff]  ;;  %v599_v4 = vld [vmem:[#allocation7] sm:$0xff]   ;;  %v244_v14 = vlaneseq }
  0x5b   : > { %501 = vmatprep.subr.bf16.mxu0 %v761_v0  ;;  %242 = vst [vmem:[#allocation3] sm:$0x1] %v761_v0  ;;  %v233_v2 = vcombine.high %v224_v1, %v224_v1  ;;  %v236_v3 = vsel %vm235_vm0, %v224_v1, 0.0  ;;  %v600_v6 = vld [vmem:[#allocation7 + $0x8] sm:$0xff]   ;;  %v601_v8 = vld [vmem:[#allocation7 + $0x10] sm:$0xff]   ;;  %v602_v9 = vld [vmem:[#allocation7 + $0x18] sm:$0xff]  }
  0x5c   : > { %502 = vmatpush3.bf16.msra.mxu0 %v599_v4  ;;  %v603_v10 = vld [vmem:[#allocation7 + $0x20] sm:$0xff]   ;;  %v604_v11 = vld [vmem:[#allocation7 + $0x28] sm:$0xff]   ;;  %v605_v12 = vld [vmem:[#allocation7 + $0x30] sm:$0xff]   ;;  %vm762_vm1 = vmmov 0   ;;  %v245_v15 = vand.u32 127, %v244_v14  ;;  %v247_v16 = vshrl.u32 %v244_v14, 7 }
  0x5d   : > { %v237_v5 = vsel %vm235_vm0, %v233_v2, 0.0  ;;  %503 = vmatprep.subr.bf16.mxu0 %v761_v0  ;;  %517 = vmatprep.mubr.msk.bf16.mxu0 %vm762_vm1, %v761_v0  ;;  %v606_v13 = vld [vmem:[#allocation7 + $0x38] sm:$0xff]   ;;  %vm251_vm2 = vcmask 24576   ;;  %v271_v23 = vld [vmem:[%s1004_s2] sm:$0x1]  ;;  %s488_s24 = sshll.u32 %s747_s15, 4 }
  0x5e   : > { %v238_v7 = vadd.f32 %v237_v5, %v236_v3  ;;  %v248_v17 = vsub.s32 %v245_v15, %v247_v16  ;;  %s216_s9 = scalar_lea.vmem [#allocation9], %s933_s19  ;;  %s953_s29 = scalar_lea.hbm %s1005_s3, %s488_s24 }
  0x5f   : > { %s381_s10 = sshll.u32 %s216_s9, 4  ;;  %s369_s6 = scalar_lea.sflag [#allocation6], %s933_s19  ;;  %s955_s10 = int_to_ptr.vmem [resolvable:$true] %s381_s10 }
  0x60   : > { %239 = vadd.xlane.f32.xlu0 %v238_v7  ;;  %504 = vmatpush3.bf16.msra.mxu0 %v600_v6  ;;  %s669_s26 = scalar_lea.vmem %s955_s10, 16  ;;  %s763_s15 = smov [#allocation9]  }
  0x61   : > { %505 = vmatprep.subr.bf16.mxu0 %v761_v0  ;;  %p670_p13 = scmp.ne.s32.totalorder %s955_s10, %s669_s26  ;;  %s673_s7 = sshll.u32 %s763_s15, 4  ;;  %s674_s7 = int_to_ptr.vmem [resolvable:$false] %s673_s7 }
  0x62   : > { %s675_s8 = scalar_lea.vmem %s674_s7, 32  ;;  %p676_p12 = scmp.lt.s32.totalorder %s955_s10, %s674_s7 }
  0x63   : > { %p671_p6 = pnand %p670_p13, %p880_p10  ;;  %p677_p11 = scmp.lt.s32.totalorder %s675_s8, %s669_s26 }
  0x64   : > { %506 = vmatpush3.bf16.msra.mxu0 %v601_v8 }
  0x65   : > { %507 = vmatprep.subr.bf16.mxu0 %v761_v0  ;;  %p672_p8 = pneg %p671_p6  ;;  %p678_p0 = por %p677_p11, %p676_p12 }
  0x67   : > { %p679_p5 = pnand %p678_p0, %p672_p8 }
  0x68   : > { %508 = vmatpush3.bf16.msra.mxu0 %v602_v9 }
  0x69   : > { %509 = vmatprep.subr.bf16.mxu0 %v761_v0 }
  0x6c   : > { %510 = vmatpush3.bf16.msra.mxu0 %v603_v10 }
  0x6d   : > { %511 = vmatprep.subr.bf16.mxu0 %v761_v0 }
  0x70   : > { %512 = vmatpush3.bf16.msra.mxu0 %v604_v11 }
  0x71   : > { %513 = vmatprep.subr.bf16.mxu0 %v761_v0 }
  0x74   : > { %514 = vmatpush3.bf16.msra.mxu0 %v605_v12 }
  0x75   : > { %515 = vmatprep.subr.bf16.mxu0 %v761_v0 }
  0x78   : > { %516 = vmatpush3.bf16.msra.mxu0 %v606_v13 }
  0xed   : > { %v240_v18 = vpop.xlane.xlu0 %239 }
  0xee   : > { %v241_v19 = vmul.f32 0.00390625, %v240_v18 }
  0xf0   : > { %v249_v20 = vrot.slane %v241_v19, %v248_v17 }
  0xf2   : > { %252 = vst.msk [vmem:[#allocation3] sm:$0x1] %vm251_vm2, %v249_v20 }
  0xf9   : > { %v253_v21 = vld [vmem:[#allocation3] sm:$0x1] }
  0xfa   : > { %v254_v22 = vpack.c.bf16 %v253_v21, %v253_v21 }
  0xfc   : > { %518 = vmatmul.mubr.bf16.vlgmr.msra.gmra.mrb[0].mxu0 %v254_v22 }
 0x1cf   : > { %v354_v24 = vpop.f32.mrb[0].mxu0 }
 0x1d0   : > { %v355_v25 = vadd.f32 %v354_v24, %v271_v23  ;;  %v519_v26 = vpop.f32.mrb[1].mxu0 }
 0x1d1   : > { %v357_v27 = vpop.f32.mrb[2].mxu0 }
 0x1d2   : > { %v360_v28 = vmax.f32 %v355_v25, 0.0  ;;  %v520_v29 = vpop.f32.mrb[3].mxu0 }
 0x1d4   : > { %v487_v30 = vmul.f32 -1.442695, %v360_v28 }
 0x1d6   : > { %607 = vpow2.f32 %v487_v30 }
 0x1e0   : > { %v608_v31 = vpop.eup %607 }
 0x1e1   : > { %v364_v32 = vadd.f32 1.0, %v608_v31 }
 0x1e3   : > { %609 = vrcp.f32 %v364_v32 }
 0x1ed   : > { %v610_v33 = vpop.eup %609 }
 0x1ee   : > { %367 = vst [vmem:[%s216_s9] sm:$0x1] %v610_v33 }
 0x1ef   : > { %682 = shalt.err (!%p679_p5)
}
 0x1f0   : > { %s683_s21 = scalar_lea.hbm %s953_s29, 16  ;;  %s687_s27 = scalar_lea.hbm %s1005_s3, 32 }
 0x1f1   : > { %p684_p9 = scmp.ne.s32.totalorder %s953_s29, %s683_s21  ;;  %p688_p7 = scmp.lt.u32.totalorder %s953_s29, %s1005_s3 }
 0x1f2   : > { %p689_p3 = scmp.lt.u32.totalorder %s687_s27, %s683_s21  ;;  %p691_p13 = scmp.lt.u32.totalorder %s683_s21, %s953_s29 }
 0x1f3   : > { %p685_p1 = pnand %p684_p9, %p880_p10 }
 0x1f4   : > { %p690_p4 = por %p689_p3, %p688_p7 }
 0x1f5   : > { %p686_p2 = pneg %p685_p1 }
 0x1f6   : > { %p692_p6 = por %p691_p13, %p690_p4 }
 0x1f8   : > { %p693_p8 = pnand %p692_p6, %p686_p2 }
 0x1fa   : > { %696 = shalt.err (!%p693_p8)
}
 0x1fb   : > { %527 = dma.vmem_to_hbm [thread:$0]  (%p880_p10), %s955_s10, 16, %s953_s29, %s369_s6  }
 0x1fc PF: > { %s393_s22 = sand.u32 1, %s735_s12   ;;  %p1023_p12 = scmp.ne.s32.totalorder %s1013_s23, 0 }
 0x1fd   : > { %p1024_p11 = scmp.ge.s32.totalorder %s755_s17, 2  ;;  %s394_s24 = scalar_lea.sflag [#allocation6], %s393_s22 }
 0x1ff   : > { %p538_p0 = pnand %p1024_p11, %p1023_p12 }
 0x201   : > { %730 = dma.done.wait (!%p538_p0), %s394_s24, 16  }
 0x202   : > { %732 = vsyncadd (!%p538_p0), %s394_s24, 4294967280  ;;  %s20_s17 = sadd.s32 1, %s755_s17   ;;  %s1025_s12 = smov %s739_s13 }
 0x203   : > { %p17_p5 = scmp.ge.s32.totalorder %s20_s17, 4   ;;  %s1026_s13 = smov %s743_s14 }
 0x204   : > { %s1027_s14 = smov %s889_s5  ;;  %s1028_s15 = smov %s751_s16 }
 0x205   : > { %s1029_s16 = smov %s1031_s28  ;;  %19 = sbr.rel (!%p17_p5) target bundleno = 7 (0x7), region = 89 }
 0x20c   :  { %398 = vsyncpa [#allocation5], 1 }
 0x20d   :  { %400 = vsyncpa [#allocation5 + $0x1], 1 }
 0x20e   :  { %401 = vsyncpa [#allocation8], 1 }
 0x20f   :  { %402 = vsyncpa [#allocation6], 1 }
 0x210   :  { %404 = vsyncpa [#allocation6 + $0x1], 1 }

</bundles_post_ra>
